<compile_context>
chip_gen: v6e
topology: v6e:2x2x1
jax: 0.10.0
libtpu: 0.0.40
codegen_flags: <defaults>
</compile_context>

<pallas_src>
import functools

import jax
import jax.numpy as jnp
from jax.experimental import pallas as pl
from jax.experimental.pallas import tpu as pltpu


# ----------------------------- helpers -------------------------------------- #

def _round_up(a, b):
    return ((a + b - 1) // b) * b


def _pad2d(a, rows, cols, dtype):
    a = a.astype(dtype)
    pr, pc = rows - a.shape[0], cols - a.shape[1]
    if pr or pc:
        a = jnp.pad(a, ((0, pr), (0, pc)))
    return a


# ----------------------------- kernel ---------------------------------------- #

def _gcn_kernel(adj_ref, x_ref, wt_ref, b_ref, o_ref, acc_ref, *, w_first):
    """One (row-tile i, contraction-tile k) grid step.

    acc_ref: f32 VMEM accumulator, resident across the k (reduction) axis.
      w_first=False : acc += adj_ik @ x_k            (acc shape [tm, f_in_pad])
      w_first=True  : acc += adj_ik @ (x_k @ W^T)    (acc shape [tm, f_out_pad])
    Epilogue (remaining matmul + bias + ReLU) runs once, at k == last.
    """
    k = pl.program_id(1)

    @pl.when(k == 0)
    def _init():
        acc_ref[...] = jnp.zeros_like(acc_ref)

    if w_first:
        xw = jnp.dot(x_ref[...], wt_ref[...], preferred_element_type=jnp.float32)
        acc_ref[...] += jnp.dot(adj_ref[...], xw.astype(adj_ref.dtype),
                                preferred_element_type=jnp.float32)
    else:
        acc_ref[...] += jnp.dot(adj_ref[...], x_ref[...],
                                preferred_element_type=jnp.float32)

    @pl.when(k == pl.num_programs(1) - 1)
    def _epilogue():
        if w_first:
            y = acc_ref[...] + b_ref[...]
        else:
            y = jnp.dot(acc_ref[...].astype(wt_ref.dtype), wt_ref[...],
                        preferred_element_type=jnp.float32) + b_ref[...]
        o_ref[...] = jnp.maximum(y, 0.0).astype(o_ref.dtype)


# ----------------------------- wrapper --------------------------------------- #

@functools.partial(jax.jit,
                   static_argnames=("dropout", "training", "compute_dtype", "tm", "tk"))
def gcn_layer(x, adj, weight, bias, *, dropout=0.5, training=False, key=None,
              compute_dtype=jnp.float32, tm=512, tk=512):
    """Pallas implementation of GCNLayer.forward:
         relu(linear(spmm(adj, F.dropout(x, dropout, training))))

    x:      [N, F_in]   float32
    adj:    [N, N]      float32 (dense; torch.spmm handled densely)
    weight: [F_out, F_in]   (nn.Linear convention)
    bias:   [F_out]
    returns [N, F_out]  float32
    """
    n, f_in = x.shape
    f_out, _ = weight.shape

    # ---- static tiling decisions (always (8,128)-aligned block shapes) ------
    tm = min(tm, _round_up(n, 8))        # adj / output row tile (sublane axis)
    tk = min(tk, _round_up(n, 128))      # adjacency contraction tile (lane axis)
    n_rpad = _round_up(n, tm)            # padded output rows
    n_kpad = _round_up(n, tk)            # padded contraction dim (= padded rows of x)
    f_in_pad = _round_up(f_in, 128)
    f_out_pad = _round_up(f_out, 128)    # lane-dense output store

    # Push the *cheaper* feature dim through the N x N contraction.
    w_first = f_out < f_in

    # ---- operand prep: dropout fold + pad + cast once, outside the hot loop --
    cdt = compute_dtype
    use_mask = training and float(dropout) > 0.0
    if use_mask:
        if key is None:
            key = jax.random.PRNGKey(0)
        keep = jax.random.bernoulli(key, 1.0 - float(dropout), shape=(n, f_in))
        scale = 1.0 / (1.0 - float(dropout))
        x = x * (keep.astype(x.dtype) * scale)   # inverted dropout, fused by XLA

    adj_p = _pad2d(adj, n_rpad, n_kpad, cdt)
    x_p = _pad2d(x, n_kpad, f_in_pad, cdt)
    wt_p = _pad2d(weight.T, f_in_pad, f_out_pad, cdt)
    b_p = _pad2d(bias.reshape(1, f_out), 1, f_out_pad, jnp.float32)

    grid = (n_rpad // tm, n_kpad // tk)
    acc_cols = f_out_pad if w_first else f_in_pad

    in_specs = [
        pl.BlockSpec((tm, tk), lambda i, k: (i, k)),               # adj tile
        pl.BlockSpec((tk, f_in_pad), lambda i, k: (k, 0)),         # x tile
        pl.BlockSpec((f_in_pad, f_out_pad), lambda i, k: (0, 0)),  # W^T (resident)
        pl.BlockSpec((1, f_out_pad), lambda i, k: (0, 0)),         # bias (resident)
    ]
    out_specs = pl.BlockSpec((tm, f_out_pad), lambda i, k: (i, 0))
    out_shape = jax.ShapeDtypeStruct((n_rpad, f_out_pad), jnp.float32)

    # advisory cost estimate (true, un-padded work)
    if w_first:
        flops = 2 * n * f_in * f_out + 2 * n * n * f_out
    else:
        flops = 2 * n * n * f_in + 2 * n * f_in * f_out
    bytes_accessed = 4 * (n * n + n * f_in + f_in * f_out + f_out + n * f_out)

    # VMEM budget: 2x-buffered adj/x tiles + resident W^T, bias, out tiles, accumulator
    itemsize = jnp.dtype(cdt).itemsize
    vmem_need = (2 * (tm * tk + tk * f_in_pad) * itemsize
                 + f_in_pad * f_out_pad * itemsize + f_out_pad * 4
                 + 2 * tm * f_out_pad * 4 + tm * acc_cols * 4)
    vmem_limit = int(min(64 * 1024 * 1024, max(32 * 1024 * 1024, 2 * vmem_need)))

    out = pl.pallas_call(
        functools.partial(_gcn_kernel, w_first=w_first),
        out_shape=out_shape,
        grid=grid,
        in_specs=in_specs,
        out_specs=out_specs,
        scratch_shapes=[pltpu.VMEM((tm, acc_cols), jnp.float32)],
        compiler_params=pltpu.CompilerParams(
            dimension_semantics=("parallel", "arbitrary"),
            vmem_limit_bytes=vmem_limit,
        ),
        cost_estimate=pl.CostEstimate(
            flops=flops, transcendentals=0, bytes_accessed=bytes_accessed),
    )(adj_p, x_p, wt_p, b_p)

    return out[:n, :f_out]


# ----------------------------- main ------------------------------------------ #

if __name__ == "__main__":
    key = jax.random.PRNGKey(0)
    k_x, k_adj, k_w, k_b, k_drop = jax.random.split(key, 5)

    N, F_IN, F_OUT = 8, 16, 32

    x = jax.random.normal(k_x, (N, F_IN), dtype=jnp.float32)

    # symmetric, row-normalized-ish dense adjacency
    a = (jax.random.uniform(k_adj, (N, N)) > 0.5).astype(jnp.float32)
    adj = a + a.T + jnp.eye(N, dtype=jnp.float32)
    adj = adj / jnp.maximum(adj.sum(-1, keepdims=True), 1.0)

    # nn.Linear-style init (uniform in +/- 1/sqrt(fan_in))
    bound = 1.0 / (F_IN ** 0.5)
    weight = jax.random.uniform(k_w, (F_OUT, F_IN), minval=-bound, maxval=bound,
                                dtype=jnp.float32)
    bias = jax.random.uniform(k_b, (F_OUT,), minval=-bound, maxval=bound,
                              dtype=jnp.float32)

    # ---- eval mode (dropout is identity) ------------------------------------
    out = jax.block_until_ready(
        gcn_layer(x, adj, weight, bias, dropout=0.5, training=False))
    ref = jnp.maximum(adj @ x @ weight.T + bias, 0.0)
    assert out.shape == (N, F_OUT)
    assert jnp.allclose(out, ref, atol=1e-5, rtol=1e-5), "eval-mode mismatch vs reference"

    # ---- training mode (inverted dropout folded into x) ---------------------
    p = 0.5
    out_tr = jax.block_until_ready(
        gcn_layer(x, adj, weight, bias, dropout=p, training=True, key=k_drop))
    keep = jax.random.bernoulli(k_drop, 1.0 - p, shape=(N, F_IN)).astype(jnp.float32)
    ref_tr = jnp.maximum(adj @ (x * keep / (1.0 - p)) @ weight.T + bias, 0.0)
    assert out_tr.shape == (N, F_OUT)
    assert jnp.allclose(out_tr, ref_tr, atol=1e-5, rtol=1e-5), "train-mode mismatch vs reference"

    # ---- optional bf16 MXU path (v6e/v7x fast path), f32 accumulation --------
    out_bf16 = jax.block_until_ready(
        gcn_layer(x, adj, weight, bias, dropout=0.5, training=False,
                  compute_dtype=jnp.bfloat16))
    assert out_bf16.shape == (N, F_OUT)
    assert jnp.allclose(out_bf16, ref, atol=3e-2, rtol=3e-2), "bf16 path mismatch vs reference"

    print("KERNEL_OK")
</pallas_src>

<mosaic_0001>
module attributes {stable_mosaic.version = 11 : i64} {
  func.func @_gcn_kernel(%arg0: i32, %arg1: i32, %arg2: memref<8x128xf32, #tpu.memory_space<vmem>>, %arg3: memref<128x128xf32, #tpu.memory_space<vmem>>, %arg4: memref<128x128xf32, #tpu.memory_space<vmem>>, %arg5: memref<1x128xf32, #tpu.memory_space<vmem>>, %arg6: memref<8x128xf32, #tpu.memory_space<vmem>>, %arg7: memref<8x128xf32, #tpu.memory_space<vmem>>) attributes {dimension_semantics = [#tpu.dimension_semantics<parallel>, #tpu.dimension_semantics<arbitrary>], iteration_bounds = array<i64: 1, 1>, scalar_prefetch = 0 : i64, scratch_operands = 1 : i64, tpu.core_type = #tpu.core_type<tc>, window_params = [{transform_indices = @transform_0, window_bounds = array<i64: 8, 128>}, {transform_indices = @transform_1, window_bounds = array<i64: 128, 128>}, {pipeline_mode = #tpu.pipeline_mode<synchronous>, transform_indices = @transform_2, window_bounds = array<i64: 128, 128>}, {pipeline_mode = #tpu.pipeline_mode<synchronous>, transform_indices = @transform_3, window_bounds = array<i64: 1, 128>}, {transform_indices = @transform_4, window_bounds = array<i64: 8, 128>}]} {
    %c0_i32 = arith.constant 0 : i32
    %0 = arith.cmpi eq, %arg1, %c0_i32 : i32
    %1 = arith.extui %0 : i1 to i32
    %c0_i32_0 = arith.constant 0 : i32
    %2 = arith.cmpi ne, %1, %c0_i32_0 : i32
    scf.if %2 {
      %cst_10 = arith.constant 0.000000e+00 : f32
      %12 = vector.broadcast %cst_10 : f32 to vector<8x128xf32>
      %c0_11 = arith.constant 0 : index
      %c0_12 = arith.constant 0 : index
      %13 = vector.load %arg7[%c0_11, %c0_12] : memref<8x128xf32, #tpu.memory_space<vmem>>, vector<8x128xf32>
      tpu.vector_store %arg7[%c0_11, %c0_12], %12 {strides = array<i32>} : memref<8x128xf32, #tpu.memory_space<vmem>>, vector<8x128xf32>,
    } else {
    }
    %c0 = arith.constant 0 : index
    %c0_1 = arith.constant 0 : index
    %3 = vector.load %arg7[%c0, %c0_1] : memref<8x128xf32, #tpu.memory_space<vmem>>, vector<8x128xf32>
    %c0_2 = arith.constant 0 : index
    %c0_3 = arith.constant 0 : index
    %4 = vector.load %arg2[%c0_2, %c0_3] : memref<8x128xf32, #tpu.memory_space<vmem>>, vector<8x128xf32>
    %c0_4 = arith.constant 0 : index
    %c0_5 = arith.constant 0 : index
    %5 = vector.load %arg3[%c0_4, %c0_5] : memref<128x128xf32, #tpu.memory_space<vmem>>, vector<128x128xf32>
    %cst = arith.constant dense<0.000000e+00> : vector<8x128xf32>
    %6 = tpu.matmul %4, %5, %cst {dimension_numbers = #tpu.dot_dimension_numbers<[1], [0], [0], [1], [0, 0, 1, 1], [], []>} : vector<8x128xf32>, vector<128x128xf32>, vector<8x128xf32> -> vector<8x128xf32>
    %7 = arith.addf %3, %6 : vector<8x128xf32>
    %c0_6 = arith.constant 0 : index
    %c0_7 = arith.constant 0 : index
    %8 = vector.load %arg7[%c0_6, %c0_7] : memref<8x128xf32, #tpu.memory_space<vmem>>, vector<8x128xf32>
    tpu.vector_store %arg7[%c0_6, %c0_7], %7 {strides = array<i32>} : memref<8x128xf32, #tpu.memory_space<vmem>>, vector<8x128xf32>,
    %c0_i32_8 = arith.constant 0 : i32
    %9 = arith.cmpi eq, %arg1, %c0_i32_8 : i32
    %10 = arith.extui %9 : i1 to i32
    %c0_i32_9 = arith.constant 0 : i32
    %11 = arith.cmpi ne, %10, %c0_i32_9 : i32
    scf.if %11 {
      %c0_10 = arith.constant 0 : index
      %c0_11 = arith.constant 0 : index
      %12 = vector.load %arg7[%c0_10, %c0_11] : memref<8x128xf32, #tpu.memory_space<vmem>>, vector<8x128xf32>
      %c0_12 = arith.constant 0 : index
      %c0_13 = arith.constant 0 : index
      %13 = vector.load %arg4[%c0_12, %c0_13] : memref<128x128xf32, #tpu.memory_space<vmem>>, vector<128x128xf32>
      %cst_14 = arith.constant dense<0.000000e+00> : vector<8x128xf32>
      %14 = tpu.matmul %12, %13, %cst_14 {dimension_numbers = #tpu.dot_dimension_numbers<[1], [0], [0], [1], [0, 0, 1, 1], [], []>} : vector<8x128xf32>, vector<128x128xf32>, vector<8x128xf32> -> vector<8x128xf32>
      %c0_15 = arith.constant 0 : index
      %c0_16 = arith.constant 0 : index
      %15 = vector.load %arg5[%c0_15, %c0_16] : memref<1x128xf32, #tpu.memory_space<vmem>>, vector<1x128xf32>
      %16 = vector.broadcast %15 : vector<1x128xf32> to vector<8x128xf32>
      %17 = arith.addf %14, %16 : vector<8x128xf32>
      %cst_17 = arith.constant 0.000000e+00 : f32
      %18 = vector.broadcast %cst_17 : f32 to vector<8x128xf32>
      %19 = arith.maximumf %17, %18 : vector<8x128xf32>
      %c0_18 = arith.constant 0 : index
      %c0_19 = arith.constant 0 : index
      %20 = vector.load %arg6[%c0_18, %c0_19] : memref<8x128xf32, #tpu.memory_space<vmem>>, vector<8x128xf32>
      tpu.vector_store %arg6[%c0_18, %c0_19], %19 {strides = array<i32>} : memref<8x128xf32, #tpu.memory_space<vmem>>, vector<8x128xf32>,
    } else {
    }
    return
  }
  func.func @transform_0(%arg0: i32, %arg1: i32) -> (i32, i32) {
    %c0_i32 = arith.constant 0 : i32
    return %arg0, %arg1 : i32, i32
  }
  func.func @transform_1(%arg0: i32, %arg1: i32) -> (i32, i32) {
    %c0_i32 = arith.constant 0 : i32
    %c0_i32_0 = arith.constant 0 : i32
    return %arg1, %c0_i32 : i32, i32
  }
  func.func @transform_2(%arg0: i32, %arg1: i32) -> (i32, i32) {
    %c0_i32 = arith.constant 0 : i32
    %c0_i32_0 = arith.constant 0 : i32
    %c0_i32_1 = arith.constant 0 : i32
    return %c0_i32, %c0_i32_0 : i32, i32
  }
  func.func @transform_3(%arg0: i32, %arg1: i32) -> (i32, i32) {
    %c0_i32 = arith.constant 0 : i32
    %c0_i32_0 = arith.constant 0 : i32
    %c0_i32_1 = arith.constant 0 : i32
    return %c0_i32, %c0_i32_0 : i32, i32
  }
  func.func @transform_4(%arg0: i32, %arg1: i32) -> (i32, i32) {
    %c0_i32 = arith.constant 0 : i32
    %c0_i32_0 = arith.constant 0 : i32
    return %arg0, %c0_i32 : i32, i32
  }
}

</mosaic_0001>

<bundles_post_ra>
// kernel: gcn_layer.1
= control target key start
LH: loop header
LB: loop body
LE: loop exit
PB: predicated region body
PF: predicated region fallthrough
CT: control target
= control target key end

     0   :  { %v356_v1 = vmov 0.0   ;;  %vm357_vm0 = vmmov 0   ;;  %s523_s0 = inlined_call_operand.vmem [shape: f32[8,128], index: 0, kind: input, shape index: {}]   ;;  %s524_s1 = inlined_call_operand.vmem [shape: f32[128,128], index: 1, kind: input, shape index: {}]   ;;  %s525_s2 = inlined_call_operand.vmem [shape: f32[128,128], index: 2, kind: input, shape index: {}]   ;;  %s526_s3 = inlined_call_operand.vmem [shape: f32[1,128], index: 3, kind: input, shape index: {}]   ;;  %s527_s4 = inlined_call_operand.hbm [shape: f32[8,128], index: 4, kind: output, shape index: {}]  }
   0x1   :  { %v40_v0 = vld [vmem:[%s524_s1 + $0x78] sm:$0xff]  ;;  %261 = vmatprep.subr.mxu0 %v356_v1  ;;  %v39_v2 = vld [vmem:[%s524_s1 + $0x70] sm:$0xff]  ;;  %293 = vmatprep.mubr.msk.f32.mxu0 %vm357_vm0, %v356_v1  ;;  %v38_v3 = vld [vmem:[%s524_s1 + $0x68] sm:$0xff] }
   0x2   :  { %262 = vmatpush3.msra.mxu0 %v40_v0  ;;  %296 = vmatprep.subr.mxu1 %v356_v1  ;;  %v37_v4 = vld [vmem:[%s524_s1 + $0x60] sm:$0xff]  ;;  %v132_v5 = vld [vmem:[%s525_s2 + $0x78] sm:$0xff]  ;;  %v131_v6 = vld [vmem:[%s525_s2 + $0x70] sm:$0xff] }
   0x3   :  { %263 = vmatprep.subr.mxu0 %v356_v1  ;;  %328 = vmatprep.mubr.msk.f32.mxu1 %vm357_vm0, %v356_v1  ;;  %v36_v7 = vld [vmem:[%s524_s1 + $0x58] sm:$0xff]  ;;  %v130_v8 = vld [vmem:[%s525_s2 + $0x68] sm:$0xff]  ;;  %v35_v9 = vld [vmem:[%s524_s1 + $0x50] sm:$0xff] }
   0x4   :  { %264 = vmatpush3.msra.mxu0 %v39_v2  ;;  %297 = vmatpush3.msra.mxu1 %v132_v5  ;;  %v129_v10 = vld [vmem:[%s525_s2 + $0x60] sm:$0xff] }
   0x5   :  { %265 = vmatprep.subr.mxu0 %v356_v1  ;;  %298 = vmatprep.subr.mxu1 %v356_v1 }
   0x6   :  { %266 = vmatpush3.msra.mxu0 %v38_v3  ;;  %299 = vmatpush3.msra.mxu1 %v131_v6 }
   0x7   :  { %267 = vmatprep.subr.mxu0 %v356_v1  ;;  %300 = vmatprep.subr.mxu1 %v356_v1 }
   0x8   :  { %268 = vmatpush3.msra.mxu0 %v37_v4  ;;  %301 = vmatpush3.msra.mxu1 %v130_v8 }
   0x9   :  { %269 = vmatprep.subr.mxu0 %v356_v1 }
   0xa   :  { %270 = vmatpush3.msra.mxu0 %v36_v7 }
   0xb   :  { %9 = vsyncpa [#allocation4], 0  ;;  %271 = vmatprep.subr.mxu0 %v356_v1  ;;  %v34_v11 = vld [vmem:[%s524_s1 + $0x48] sm:$0xff]  ;;  %302 = vmatprep.subr.mxu1 %v356_v1  ;;  %v128_v12 = vld [vmem:[%s525_s2 + $0x58] sm:$0xff]  ;;  %s358_s29 = smov [#allocation3]  }
   0xc   :  { %272 = vmatpush3.msra.mxu0 %v35_v9  ;;  %303 = vmatpush3.msra.mxu1 %v129_v10  ;;  %v33_v13 = vld [vmem:[%s524_s1 + $0x40] sm:$0xff]  ;;  %v127_v14 = vld [vmem:[%s525_s2 + $0x50] sm:$0xff]  ;;  %v32_v15 = vld [vmem:[%s524_s1 + $0x38] sm:$0xff]  ;;  %s218_s30 = sshll.u32 %s358_s29, 4  ;;  %s219_s30 = int_to_ptr.vmem [resolvable:$true] %s218_s30 }
   0xd   :  { %273 = vmatprep.subr.mxu0 %v356_v1  ;;  %304 = vmatprep.subr.mxu1 %v356_v1  ;;  %v126_v16 = vld [vmem:[%s525_s2 + $0x48] sm:$0xff]  ;;  %v31_v17 = vld [vmem:[%s524_s1 + $0x30] sm:$0xff]  ;;  %v125_v18 = vld [vmem:[%s525_s2 + $0x40] sm:$0xff]  ;;  %s334_s5 = scalar_lea.vmem %s219_s30, 128  ;;  %p339_p1 = scmp.lt.s32.totalorder %s219_s30, %s219_s30 }
   0xe   :  { %274 = vmatpush3.msra.mxu0 %v34_v11  ;;  %305 = vmatpush3.msra.mxu1 %v128_v12  ;;  %v30_v19 = vld [vmem:[%s524_s1 + $0x28] sm:$0xff]  ;;  %v124_v20 = vld [vmem:[%s525_s2 + $0x38] sm:$0xff]  ;;  %v29_v21 = vld [vmem:[%s524_s1 + $0x20] sm:$0xff]  ;;  %p335_p0 = scmp.ne.s32.totalorder %s219_s30, %s334_s5  ;;  %p340_p2 = scmp.lt.s32.totalorder %s334_s5, %s334_s5 }
   0xf   :  { %275 = vmatprep.subr.mxu0 %v356_v1  ;;  %306 = vmatprep.subr.mxu1 %v356_v1  ;;  %v123_v22 = vld [vmem:[%s525_s2 + $0x30] sm:$0xff]  ;;  %v28_v23 = vld [vmem:[%s524_s1 + $0x18] sm:$0xff]  ;;  %v122_v24 = vld [vmem:[%s525_s2 + $0x28] sm:$0xff] }
  0x10   :  { %276 = vmatpush3.msra.mxu0 %v33_v13  ;;  %307 = vmatpush3.msra.mxu1 %v127_v14  ;;  %v27_v25 = vld [vmem:[%s524_s1 + $0x10] sm:$0xff]  ;;  %v121_v26 = vld [vmem:[%s525_s2 + $0x20] sm:$0xff]  ;;  %v26_v27 = vld [vmem:[%s524_s1 + $0x8] sm:$0xff]  ;;  %p341_p3 = por %p340_p2, %p339_p1 }
  0x11   :  { %277 = vmatprep.subr.mxu0 %v356_v1  ;;  %308 = vmatprep.subr.mxu1 %v356_v1  ;;  %v120_v28 = vld [vmem:[%s525_s2 + $0x18] sm:$0xff]  ;;  %v25_v29 = vld [vmem:[%s524_s1] sm:$0xff]  ;;  %v119_v30 = vld [vmem:[%s525_s2 + $0x10] sm:$0xff] }
  0x12   :  { %278 = vmatpush3.msra.mxu0 %v32_v15  ;;  %309 = vmatpush3.msra.mxu1 %v126_v16  ;;  %v24_v31 = vld [vmem:[%s523_s0] sm:$0xff]  ;;  %v118_v32 = vld [vmem:[%s525_s2 + $0x8] sm:$0xff]  ;;  %p342_p4 = pnand %p341_p3, %p335_p0 }
  0x13   :  { %279 = vmatprep.subr.mxu0 %v356_v1  ;;  %310 = vmatprep.subr.mxu1 %v356_v1  ;;  %v117_v33 = vld [vmem:[%s525_s2] sm:$0xff] }
  0x14   :  { %280 = vmatpush3.msra.mxu0 %v31_v17  ;;  %311 = vmatpush3.msra.mxu1 %v125_v18  ;;  %v226_v36 = vld [vmem:[%s526_s3] ss:$0 sm:$0xff] }
  0x15   :  { %281 = vmatprep.subr.mxu0 %v356_v1  ;;  %312 = vmatprep.subr.mxu1 %v356_v1 }
  0x16   :  { %282 = vmatpush3.msra.mxu0 %v30_v19  ;;  %313 = vmatpush3.msra.mxu1 %v124_v20 }
  0x17   :  { %283 = vmatprep.subr.mxu0 %v356_v1  ;;  %314 = vmatprep.subr.mxu1 %v356_v1 }
  0x18   :  { %284 = vmatpush3.msra.mxu0 %v29_v21  ;;  %315 = vmatpush3.msra.mxu1 %v123_v22 }
  0x19   :  { %285 = vmatprep.subr.mxu0 %v356_v1  ;;  %316 = vmatprep.subr.mxu1 %v356_v1 }
  0x1a   :  { %286 = vmatpush3.msra.mxu0 %v28_v23  ;;  %317 = vmatpush3.msra.mxu1 %v122_v24 }
  0x1b   :  { %287 = vmatprep.subr.mxu0 %v356_v1  ;;  %318 = vmatprep.subr.mxu1 %v356_v1 }
  0x1c   :  { %288 = vmatpush3.msra.mxu0 %v27_v25  ;;  %319 = vmatpush3.msra.mxu1 %v121_v26 }
  0x1d   :  { %289 = vmatprep.subr.mxu0 %v356_v1  ;;  %320 = vmatprep.subr.mxu1 %v356_v1 }
  0x1e   :  { %290 = vmatpush3.msra.mxu0 %v26_v27  ;;  %321 = vmatpush3.msra.mxu1 %v120_v28 }
  0x1f   :  { %291 = vmatprep.subr.mxu0 %v356_v1  ;;  %322 = vmatprep.subr.mxu1 %v356_v1 }
  0x20   :  { %292 = vmatpush3.msra.mxu0 %v25_v29  ;;  %323 = vmatpush3.msra.mxu1 %v119_v30 }
  0x21   :  { %294 = vmatmul.mubr.f32.vlgmr.msra.gmra.mxu0 %v24_v31  ;;  %324 = vmatprep.subr.mxu1 %v356_v1 }
  0x22   :  { %325 = vmatpush3.msra.mxu1 %v118_v32 }
  0x23   :  { %326 = vmatprep.subr.mxu1 %v356_v1 }
  0x24   :  { %327 = vmatpush3.msra.mxu1 %v117_v33 }
  0xe1   :  { %v107_v34 = vpop.f32.mrf.mxu0 }
  0xe2   :  { %329 = vmatmul.mubr.f32.vlgmr.msra.gmra.mxu1 %v107_v34 }
  0xe3   :  { %v295_v35 = vpop.f32.mrf.mxu0 }
 0x1a2   :  { %v206_v37 = vpop.f32.mrf.mxu1 }
 0x1a3   :  { %v207_v38 = vadd.f32 %v226_v36, %v206_v37 }
 0x1a4   :  { %v330_v39 = vpop.f32.mrf.mxu1 }
 0x1a5   :  { %v210_v40 = vmax.f32 %v207_v38, 0.0 }
 0x1a7   :  { %211 = vst [vmem:[#allocation3] sm:$0xff] %v210_v40 }
 0x1a8   :  { %345 = shalt.err (!%p342_p4)
}
 0x1a9   :  { %221 = dma.vmem_to_hbm [thread:$0]  %s219_s30, 128, %s527_s4, [#allocation4]  }
 0x1aa   :  { %354 = dma.done.wait [#allocation4], 128  }
 0x1ab   :  { %355 = vsyncadd [#allocation4], 4294967168 }
 0x1ac   :  { %225 = vsyncpa [#allocation4], 1 }

</bundles_post_ra>
